<compile_context>
chip_gen: v6e
topology: v6e:2x2x1
jax: 0.10.0
libtpu: 0.0.40
codegen_flags: <defaults>
</compile_context>

<pallas_src>
import jax
import jax.numpy as jnp
from jax.experimental import pallas as pl
from jax.experimental.pallas import tpu as pltpu


_CHUNK = 8  # sublane rows per inner-loop chunk (8 rows x 128 lanes = 1024 samples)


def _mlp_kernel(w1_ref, b1_ref, w2_ref, b2_ref, w3_ref, b3_ref, x_ref, o_ref):
    # x_ref: (4, rows, 128) f32 VMEM tile; feature k at x_ref[k], batch dense over
    # (sublane, lane). Weights/biases are f32 scalars in SMEM, stored (in, out).
    rows = x_ref.shape[1]
    num_chunks = rows // _CHUNK

    def affine(inp, w_ref, b_ref, j):
        # out_j = sum_k w[k, j] * inp_k + b[j]   (scalar-broadcast MACs on the VPU)
        acc = inp[0] * w_ref[0, j]
        for k in range(1, 4):
            acc = acc + inp[k] * w_ref[k, j]
        return acc + b_ref[j]

    @pl.loop(0, num_chunks)
    def _(c):
        r = pl.multiple_of(c * _CHUNK, _CHUNK)
        x = [x_ref[k, pl.ds(r, _CHUNK), :] for k in range(4)]                    # 4 x (CH,128)

        h1 = [jnp.maximum(affine(x,  w1_ref, b1_ref, j), 0.0) for j in range(4)]  # fc_relu1
        h2 = [jnp.maximum(affine(h1, w2_ref, b2_ref, j), 0.0) for j in range(4)]  # fc_relu2

        z = h2[0] * w3_ref[0]                                                      # linear3
        for k in range(1, 4):
            z = z + h2[k] * w3_ref[k]
        z = z + b3_ref[0]

        # sigmoid(z) = 0.5 * tanh(z / 2) + 0.5   (tanh runs on the EUP slot)
        o_ref[pl.ds(r, _CHUNK), :] = 0.5 * jnp.tanh(0.5 * z) + 0.5


def _round_up(n, m):
    return (n + m - 1) // m * m


def orig_module_forward(x, params, *, preferred_block_b=262144):
    """x: (B, 4) float32 -> (B, 1) float32."""
    w1, b1, w2, b2, w3, b3 = params
    B, F = x.shape
    assert F == 4

    # ---- Adaptive tiling -----------------------------------------------------
    min_tile = 1024                                   # 8 sublanes x 128 lanes
    Bp1 = _round_up(max(B, 1), min_tile)              # pad only to min legal tile
    if Bp1 > min_tile:
        # cap the tile so nblk >= 2 (both TensorCores on megacore parts)
        block_b = min(preferred_block_b, _round_up((Bp1 + 1) // 2, min_tile))
    else:
        block_b = min_tile
    nblk = (Bp1 + block_b - 1) // block_b
    Bp = nblk * block_b
    rows = block_b // 128                              # sublane rows per tile

    # ---- Layout plumbing: (B,4) -> feature-major (4,Bp) -> (4, Bp//128, 128) --
    # Only the tail is zero-filled; padded rows are computed on zeros & dropped.
    xt = jnp.pad(x.astype(jnp.float32).T, ((0, 0), (0, Bp - B)))
    xt = xt.reshape(4, Bp // 128, 128)

    # ---- VMEM budget: double-buffered x tile + out tile + headroom ------------
    needed = 2 * (4 * block_b * 4) + 2 * (block_b * 4) + (2 << 20)
    vmem_limit = int(min(64 << 20, max(16 << 20, needed)))

    smem = lambda: pl.BlockSpec(memory_space=pltpu.MemorySpace.SMEM)

    out = pl.pallas_call(
        _mlp_kernel,
        out_shape=jax.ShapeDtypeStruct((Bp // 128, 128), jnp.float32),
        grid_spec=pltpu.PrefetchScalarGridSpec(
            num_scalar_prefetch=0,
            grid=(nblk,),
            in_specs=[
                smem(), smem(),                                     # w1 (4,4), b1 (4,)
                smem(), smem(),                                     # w2 (4,4), b2 (4,)
                smem(), smem(),                                     # w3 (4,),  b3 (1,)
                pl.BlockSpec((4, rows, 128), lambda i: (0, i, 0)),  # x tile
            ],
            out_specs=pl.BlockSpec((rows, 128), lambda i: (i, 0)),  # lane-dense out
        ),
        compiler_params=pltpu.CompilerParams(
            dimension_semantics=("parallel",),
            vmem_limit_bytes=vmem_limit,
        ),
    )(w1, b1, w2, b2, w3, b3, xt)

    return out.reshape(Bp)[:B].reshape(B, 1)


def init_params(key):
    """Deterministic init matching the PyTorch layer shapes.

    PyTorch shapes:  fc_relu1/2: Linear(4,4) -> W (4,4), b (4,)
                     linear3:    Linear(4,1) -> W (1,4), b (1,)
    Stored here as (in, out) weights (so the math is x @ W + b) and flat biases.
    (Importing a real PyTorch state_dict requires transposing W.)
    """
    ks = jax.random.split(key, 6)
    u = lambda k, shape, bound: jax.random.uniform(
        k, shape, dtype=jnp.float32, minval=-bound, maxval=bound)
    bound = 1.0 / jnp.sqrt(4.0)   # PyTorch default U(-1/sqrt(fan_in), 1/sqrt(fan_in))
    w1 = u(ks[0], (4, 4), bound); b1 = u(ks[1], (4,), bound)
    w2 = u(ks[2], (4, 4), bound); b2 = u(ks[3], (4,), bound)
    w3 = u(ks[4], (4,), bound);   b3 = u(ks[5], (1,), bound)
    return (w1, b1, w2, b2, w3, b3)


def reference_forward(x, params):
    w1, b1, w2, b2, w3, b3 = params
    h = jnp.maximum(x @ w1 + b1, 0.0)
    h = jnp.maximum(h @ w2 + b2, 0.0)
    return jax.nn.sigmoid(h @ w3[:, None] + b3)


if __name__ == "__main__":
    key = jax.random.PRNGKey(0)
    kx1, kx2, kp = jax.random.split(key, 3)
    params = init_params(kp)

    # Small batch (single 1024-row tile, minimal padding waste).
    B1 = 8
    x1 = jax.random.normal(kx1, (B1, 4), dtype=jnp.float32)
    out1 = jax.block_until_ready(orig_module_forward(x1, params))
    ref1 = reference_forward(x1, params)
    assert out1.shape == (B1, 1)
    assert jnp.allclose(out1, ref1, atol=1e-5, rtol=1e-5)

    # Medium batch exercising adaptive tiling (nblk >= 2) and the tail padding.
    B2 = 2500
    x2 = jax.random.normal(kx2, (B2, 4), dtype=jnp.float32)
    out2 = jax.block_until_ready(orig_module_forward(x2, params))
    ref2 = reference_forward(x2, params)
    assert out2.shape == (B2, 1)
    assert jnp.allclose(out2, ref2, atol=1e-5, rtol=1e-5)

    print("KERNEL_OK")
</pallas_src>

<mosaic_0001>
module attributes {stable_mosaic.version = 11 : i64} {
  func.func @_mlp_kernel(%arg0: i32, %arg1: memref<4x4xf32, #tpu.memory_space<smem>>, %arg2: memref<4xf32, #tpu.memory_space<smem>>, %arg3: memref<4x4xf32, #tpu.memory_space<smem>>, %arg4: memref<4xf32, #tpu.memory_space<smem>>, %arg5: memref<4xf32, #tpu.memory_space<smem>>, %arg6: memref<1xf32, #tpu.memory_space<smem>>, %arg7: memref<4x8x128xf32, #tpu.memory_space<vmem>>, %arg8: memref<8x128xf32, #tpu.memory_space<vmem>>) attributes {dimension_semantics = [#tpu.dimension_semantics<parallel>], iteration_bounds = array<i64: 1>, scalar_prefetch = 0 : i64, scratch_operands = 0 : i64, tpu.core_type = #tpu.core_type<tc>, window_params = [{transform_indices = @transform_0, window_bounds = array<i64: 4, 4>}, {transform_indices = @transform_1, window_bounds = array<i64: 4>}, {transform_indices = @transform_2, window_bounds = array<i64: 4, 4>}, {transform_indices = @transform_3, window_bounds = array<i64: 4>}, {transform_indices = @transform_4, window_bounds = array<i64: 4>}, {transform_indices = @transform_5, window_bounds = array<i64: 1>}, {transform_indices = @transform_6, window_bounds = array<i64: 4, 8, 128>}, {transform_indices = @transform_7, window_bounds = array<i64: 8, 128>}]} {
    %c0_i32 = arith.constant 0 : i32
    %c1_i32 = arith.constant 1 : i32
    %0 = arith.muli %c0_i32, %c1_i32 : i32
    %c0_i32_0 = arith.constant 0 : i32
    %1 = arith.addi %c0_i32_0, %0 : i32
    %c8_i32 = arith.constant 8 : i32
    %2 = arith.muli %1, %c8_i32 : i32
    %3 = tpu.assume_multiple %2, 8 : i32
    %c0 = arith.constant 0 : index
    %4 = arith.index_cast %3 : i32 to index
    %c0_1 = arith.constant 0 : index
    %5 = vector.load %arg7[%c0, %4, %c0_1] : memref<4x8x128xf32, #tpu.memory_space<vmem>>, vector<1x8x128xf32>
    %6 = vector.shape_cast %5 : vector<1x8x128xf32> to vector<8x128xf32>
    %c1 = arith.constant 1 : index
    %7 = arith.index_cast %3 : i32 to index
    %c0_2 = arith.constant 0 : index
    %8 = vector.load %arg7[%c1, %7, %c0_2] : memref<4x8x128xf32, #tpu.memory_space<vmem>>, vector<1x8x128xf32>
    %9 = vector.shape_cast %8 : vector<1x8x128xf32> to vector<8x128xf32>
    %c2 = arith.constant 2 : index
    %10 = arith.index_cast %3 : i32 to index
    %c0_3 = arith.constant 0 : index
    %11 = vector.load %arg7[%c2, %10, %c0_3] : memref<4x8x128xf32, #tpu.memory_space<vmem>>, vector<1x8x128xf32>
    %12 = vector.shape_cast %11 : vector<1x8x128xf32> to vector<8x128xf32>
    %c3 = arith.constant 3 : index
    %13 = arith.index_cast %3 : i32 to index
    %c0_4 = arith.constant 0 : index
    %14 = vector.load %arg7[%c3, %13, %c0_4] : memref<4x8x128xf32, #tpu.memory_space<vmem>>, vector<1x8x128xf32>
    %15 = vector.shape_cast %14 : vector<1x8x128xf32> to vector<8x128xf32>
    %c0_5 = arith.constant 0 : index
    %c0_6 = arith.constant 0 : index
    %16 = memref.load %arg1[%c0_5, %c0_6] : memref<4x4xf32, #tpu.memory_space<smem>>
    %17 = vector.broadcast %16 : f32 to vector<8x128xf32>
    %18 = arith.mulf %6, %17 : vector<8x128xf32>
    %c1_7 = arith.constant 1 : index
    %c0_8 = arith.constant 0 : index
    %19 = memref.load %arg1[%c1_7, %c0_8] : memref<4x4xf32, #tpu.memory_space<smem>>
    %20 = vector.broadcast %19 : f32 to vector<8x128xf32>
    %21 = arith.mulf %9, %20 : vector<8x128xf32>
    %22 = arith.addf %18, %21 : vector<8x128xf32>
    %c2_9 = arith.constant 2 : index
    %c0_10 = arith.constant 0 : index
    %23 = memref.load %arg1[%c2_9, %c0_10] : memref<4x4xf32, #tpu.memory_space<smem>>
    %24 = vector.broadcast %23 : f32 to vector<8x128xf32>
    %25 = arith.mulf %12, %24 : vector<8x128xf32>
    %26 = arith.addf %22, %25 : vector<8x128xf32>
    %c3_11 = arith.constant 3 : index
    %c0_12 = arith.constant 0 : index
    %27 = memref.load %arg1[%c3_11, %c0_12] : memref<4x4xf32, #tpu.memory_space<smem>>
    %28 = vector.broadcast %27 : f32 to vector<8x128xf32>
    %29 = arith.mulf %15, %28 : vector<8x128xf32>
    %30 = arith.addf %26, %29 : vector<8x128xf32>
    %c0_13 = arith.constant 0 : index
    %31 = memref.load %arg2[%c0_13] : memref<4xf32, #tpu.memory_space<smem>>
    %32 = vector.broadcast %31 : f32 to vector<8x128xf32>
    %33 = arith.addf %30, %32 : vector<8x128xf32>
    %cst = arith.constant 0.000000e+00 : f32
    %34 = vector.broadcast %cst : f32 to vector<8x128xf32>
    %35 = arith.maximumf %33, %34 : vector<8x128xf32>
    %c0_14 = arith.constant 0 : index
    %c1_15 = arith.constant 1 : index
    %36 = memref.load %arg1[%c0_14, %c1_15] : memref<4x4xf32, #tpu.memory_space<smem>>
    %37 = vector.broadcast %36 : f32 to vector<8x128xf32>
    %38 = arith.mulf %6, %37 : vector<8x128xf32>
    %c1_16 = arith.constant 1 : index
    %c1_17 = arith.constant 1 : index
    %39 = memref.load %arg1[%c1_16, %c1_17] : memref<4x4xf32, #tpu.memory_space<smem>>
    %40 = vector.broadcast %39 : f32 to vector<8x128xf32>
    %41 = arith.mulf %9, %40 : vector<8x128xf32>
    %42 = arith.addf %38, %41 : vector<8x128xf32>
    %c2_18 = arith.constant 2 : index
    %c1_19 = arith.constant 1 : index
    %43 = memref.load %arg1[%c2_18, %c1_19] : memref<4x4xf32, #tpu.memory_space<smem>>
    %44 = vector.broadcast %43 : f32 to vector<8x128xf32>
    %45 = arith.mulf %12, %44 : vector<8x128xf32>
    %46 = arith.addf %42, %45 : vector<8x128xf32>
    %c3_20 = arith.constant 3 : index
    %c1_21 = arith.constant 1 : index
    %47 = memref.load %arg1[%c3_20, %c1_21] : memref<4x4xf32, #tpu.memory_space<smem>>
    %48 = vector.broadcast %47 : f32 to vector<8x128xf32>
    %49 = arith.mulf %15, %48 : vector<8x128xf32>
    %50 = arith.addf %46, %49 : vector<8x128xf32>
    %c1_22 = arith.constant 1 : index
    %51 = memref.load %arg2[%c1_22] : memref<4xf32, #tpu.memory_space<smem>>
    %52 = vector.broadcast %51 : f32 to vector<8x128xf32>
    %53 = arith.addf %50, %52 : vector<8x128xf32>
    %cst_23 = arith.constant 0.000000e+00 : f32
    %54 = vector.broadcast %cst_23 : f32 to vector<8x128xf32>
    %55 = arith.maximumf %53, %54 : vector<8x128xf32>
    %c0_24 = arith.constant 0 : index
    %c2_25 = arith.constant 2 : index
    %56 = memref.load %arg1[%c0_24, %c2_25] : memref<4x4xf32, #tpu.memory_space<smem>>
    %57 = vector.broadcast %56 : f32 to vector<8x128xf32>
    %58 = arith.mulf %6, %57 : vector<8x128xf32>
    %c1_26 = arith.constant 1 : index
    %c2_27 = arith.constant 2 : index
    %59 = memref.load %arg1[%c1_26, %c2_27] : memref<4x4xf32, #tpu.memory_space<smem>>
    %60 = vector.broadcast %59 : f32 to vector<8x128xf32>
    %61 = arith.mulf %9, %60 : vector<8x128xf32>
    %62 = arith.addf %58, %61 : vector<8x128xf32>
    %c2_28 = arith.constant 2 : index
    %c2_29 = arith.constant 2 : index
    %63 = memref.load %arg1[%c2_28, %c2_29] : memref<4x4xf32, #tpu.memory_space<smem>>
    %64 = vector.broadcast %63 : f32 to vector<8x128xf32>
    %65 = arith.mulf %12, %64 : vector<8x128xf32>
    %66 = arith.addf %62, %65 : vector<8x128xf32>
    %c3_30 = arith.constant 3 : index
    %c2_31 = arith.constant 2 : index
    %67 = memref.load %arg1[%c3_30, %c2_31] : memref<4x4xf32, #tpu.memory_space<smem>>
    %68 = vector.broadcast %67 : f32 to vector<8x128xf32>
    %69 = arith.mulf %15, %68 : vector<8x128xf32>
    %70 = arith.addf %66, %69 : vector<8x128xf32>
    %c2_32 = arith.constant 2 : index
    %71 = memref.load %arg2[%c2_32] : memref<4xf32, #tpu.memory_space<smem>>
    %72 = vector.broadcast %71 : f32 to vector<8x128xf32>
    %73 = arith.addf %70, %72 : vector<8x128xf32>
    %cst_33 = arith.constant 0.000000e+00 : f32
    %74 = vector.broadcast %cst_33 : f32 to vector<8x128xf32>
    %75 = arith.maximumf %73, %74 : vector<8x128xf32>
    %c0_34 = arith.constant 0 : index
    %c3_35 = arith.constant 3 : index
    %76 = memref.load %arg1[%c0_34, %c3_35] : memref<4x4xf32, #tpu.memory_space<smem>>
    %77 = vector.broadcast %76 : f32 to vector<8x128xf32>
    %78 = arith.mulf %6, %77 : vector<8x128xf32>
    %c1_36 = arith.constant 1 : index
    %c3_37 = arith.constant 3 : index
    %79 = memref.load %arg1[%c1_36, %c3_37] : memref<4x4xf32, #tpu.memory_space<smem>>
    %80 = vector.broadcast %79 : f32 to vector<8x128xf32>
    %81 = arith.mulf %9, %80 : vector<8x128xf32>
    %82 = arith.addf %78, %81 : vector<8x128xf32>
    %c2_38 = arith.constant 2 : index
    %c3_39 = arith.constant 3 : index
    %83 = memref.load %arg1[%c2_38, %c3_39] : memref<4x4xf32, #tpu.memory_space<smem>>
    %84 = vector.broadcast %83 : f32 to vector<8x128xf32>
    %85 = arith.mulf %12, %84 : vector<8x128xf32>
    %86 = arith.addf %82, %85 : vector<8x128xf32>
    %c3_40 = arith.constant 3 : index
    %c3_41 = arith.constant 3 : index
    %87 = memref.load %arg1[%c3_40, %c3_41] : memref<4x4xf32, #tpu.memory_space<smem>>
    %88 = vector.broadcast %87 : f32 to vector<8x128xf32>
    %89 = arith.mulf %15, %88 : vector<8x128xf32>
    %90 = arith.addf %86, %89 : vector<8x128xf32>
    %c3_42 = arith.constant 3 : index
    %91 = memref.load %arg2[%c3_42] : memref<4xf32, #tpu.memory_space<smem>>
    %92 = vector.broadcast %91 : f32 to vector<8x128xf32>
    %93 = arith.addf %90, %92 : vector<8x128xf32>
    %cst_43 = arith.constant 0.000000e+00 : f32
    %94 = vector.broadcast %cst_43 : f32 to vector<8x128xf32>
    %95 = arith.maximumf %93, %94 : vector<8x128xf32>
    %c0_44 = arith.constant 0 : index
    %c0_45 = arith.constant 0 : index
    %96 = memref.load %arg3[%c0_44, %c0_45] : memref<4x4xf32, #tpu.memory_space<smem>>
    %97 = vector.broadcast %96 : f32 to vector<8x128xf32>
    %98 = arith.mulf %35, %97 : vector<8x128xf32>
    %c1_46 = arith.constant 1 : index
    %c0_47 = arith.constant 0 : index
    %99 = memref.load %arg3[%c1_46, %c0_47] : memref<4x4xf32, #tpu.memory_space<smem>>
    %100 = vector.broadcast %99 : f32 to vector<8x128xf32>
    %101 = arith.mulf %55, %100 : vector<8x128xf32>
    %102 = arith.addf %98, %101 : vector<8x128xf32>
    %c2_48 = arith.constant 2 : index
    %c0_49 = arith.constant 0 : index
    %103 = memref.load %arg3[%c2_48, %c0_49] : memref<4x4xf32, #tpu.memory_space<smem>>
    %104 = vector.broadcast %103 : f32 to vector<8x128xf32>
    %105 = arith.mulf %75, %104 : vector<8x128xf32>
    %106 = arith.addf %102, %105 : vector<8x128xf32>
    %c3_50 = arith.constant 3 : index
    %c0_51 = arith.constant 0 : index
    %107 = memref.load %arg3[%c3_50, %c0_51] : memref<4x4xf32, #tpu.memory_space<smem>>
    %108 = vector.broadcast %107 : f32 to vector<8x128xf32>
    %109 = arith.mulf %95, %108 : vector<8x128xf32>
    %110 = arith.addf %106, %109 : vector<8x128xf32>
    %c0_52 = arith.constant 0 : index
    %111 = memref.load %arg4[%c0_52] : memref<4xf32, #tpu.memory_space<smem>>
    %112 = vector.broadcast %111 : f32 to vector<8x128xf32>
    %113 = arith.addf %110, %112 : vector<8x128xf32>
    %cst_53 = arith.constant 0.000000e+00 : f32
    %114 = vector.broadcast %cst_53 : f32 to vector<8x128xf32>
    %115 = arith.maximumf %113, %114 : vector<8x128xf32>
    %c0_54 = arith.constant 0 : index
    %c1_55 = arith.constant 1 : index
    %116 = memref.load %arg3[%c0_54, %c1_55] : memref<4x4xf32, #tpu.memory_space<smem>>
    %117 = vector.broadcast %116 : f32 to vector<8x128xf32>
    %118 = arith.mulf %35, %117 : vector<8x128xf32>
    %c1_56 = arith.constant 1 : index
    %c1_57 = arith.constant 1 : index
    %119 = memref.load %arg3[%c1_56, %c1_57] : memref<4x4xf32, #tpu.memory_space<smem>>
    %120 = vector.broadcast %119 : f32 to vector<8x128xf32>
    %121 = arith.mulf %55, %120 : vector<8x128xf32>
    %122 = arith.addf %118, %121 : vector<8x128xf32>
    %c2_58 = arith.constant 2 : index
    %c1_59 = arith.constant 1 : index
    %123 = memref.load %arg3[%c2_58, %c1_59] : memref<4x4xf32, #tpu.memory_space<smem>>
    %124 = vector.broadcast %123 : f32 to vector<8x128xf32>
    %125 = arith.mulf %75, %124 : vector<8x128xf32>
    %126 = arith.addf %122, %125 : vector<8x128xf32>
    %c3_60 = arith.constant 3 : index
    %c1_61 = arith.constant 1 : index
    %127 = memref.load %arg3[%c3_60, %c1_61] : memref<4x4xf32, #tpu.memory_space<smem>>
    %128 = vector.broadcast %127 : f32 to vector<8x128xf32>
    %129 = arith.mulf %95, %128 : vector<8x128xf32>
    %130 = arith.addf %126, %129 : vector<8x128xf32>
    %c1_62 = arith.constant 1 : index
    %131 = memref.load %arg4[%c1_62] : memref<4xf32, #tpu.memory_space<smem>>
    %132 = vector.broadcast %131 : f32 to vector<8x128xf32>
    %133 = arith.addf %130, %132 : vector<8x128xf32>
    %cst_63 = arith.constant 0.000000e+00 : f32
    %134 = vector.broadcast %cst_63 : f32 to vector<8x128xf32>
    %135 = arith.maximumf %133, %134 : vector<8x128xf32>
    %c0_64 = arith.constant 0 : index
    %c2_65 = arith.constant 2 : index
    %136 = memref.load %arg3[%c0_64, %c2_65] : memref<4x4xf32, #tpu.memory_space<smem>>
    %137 = vector.broadcast %136 : f32 to vector<8x128xf32>
    %138 = arith.mulf %35, %137 : vector<8x128xf32>
    %c1_66 = arith.constant 1 : index
    %c2_67 = arith.constant 2 : index
    %139 = memref.load %arg3[%c1_66, %c2_67] : memref<4x4xf32, #tpu.memory_space<smem>>
    %140 = vector.broadcast %139 : f32 to vector<8x128xf32>
    %141 = arith.mulf %55, %140 : vector<8x128xf32>
    %142 = arith.addf %138, %141 : vector<8x128xf32>
    %c2_68 = arith.constant 2 : index
    %c2_69 = arith.constant 2 : index
    %143 = memref.load %arg3[%c2_68, %c2_69] : memref<4x4xf32, #tpu.memory_space<smem>>
    %144 = vector.broadcast %143 : f32 to vector<8x128xf32>
    %145 = arith.mulf %75, %144 : vector<8x128xf32>
    %146 = arith.addf %142, %145 : vector<8x128xf32>
    %c3_70 = arith.constant 3 : index
    %c2_71 = arith.constant 2 : index
    %147 = memref.load %arg3[%c3_70, %c2_71] : memref<4x4xf32, #tpu.memory_space<smem>>
    %148 = vector.broadcast %147 : f32 to vector<8x128xf32>
    %149 = arith.mulf %95, %148 : vector<8x128xf32>
    %150 = arith.addf %146, %149 : vector<8x128xf32>
    %c2_72 = arith.constant 2 : index
    %151 = memref.load %arg4[%c2_72] : memref<4xf32, #tpu.memory_space<smem>>
    %152 = vector.broadcast %151 : f32 to vector<8x128xf32>
    %153 = arith.addf %150, %152 : vector<8x128xf32>
    %cst_73 = arith.constant 0.000000e+00 : f32
    %154 = vector.broadcast %cst_73 : f32 to vector<8x128xf32>
    %155 = arith.maximumf %153, %154 : vector<8x128xf32>
    %c0_74 = arith.constant 0 : index
    %c3_75 = arith.constant 3 : index
    %156 = memref.load %arg3[%c0_74, %c3_75] : memref<4x4xf32, #tpu.memory_space<smem>>
    %157 = vector.broadcast %156 : f32 to vector<8x128xf32>
    %158 = arith.mulf %35, %157 : vector<8x128xf32>
    %c1_76 = arith.constant 1 : index
    %c3_77 = arith.constant 3 : index
    %159 = memref.load %arg3[%c1_76, %c3_77] : memref<4x4xf32, #tpu.memory_space<smem>>
    %160 = vector.broadcast %159 : f32 to vector<8x128xf32>
    %161 = arith.mulf %55, %160 : vector<8x128xf32>
    %162 = arith.addf %158, %161 : vector<8x128xf32>
    %c2_78 = arith.constant 2 : index
    %c3_79 = arith.constant 3 : index
    %163 = memref.load %arg3[%c2_78, %c3_79] : memref<4x4xf32, #tpu.memory_space<smem>>
    %164 = vector.broadcast %163 : f32 to vector<8x128xf32>
    %165 = arith.mulf %75, %164 : vector<8x128xf32>
    %166 = arith.addf %162, %165 : vector<8x128xf32>
    %c3_80 = arith.constant 3 : index
    %c3_81 = arith.constant 3 : index
    %167 = memref.load %arg3[%c3_80, %c3_81] : memref<4x4xf32, #tpu.memory_space<smem>>
    %168 = vector.broadcast %167 : f32 to vector<8x128xf32>
    %169 = arith.mulf %95, %168 : vector<8x128xf32>
    %170 = arith.addf %166, %169 : vector<8x128xf32>
    %c3_82 = arith.constant 3 : index
    %171 = memref.load %arg4[%c3_82] : memref<4xf32, #tpu.memory_space<smem>>
    %172 = vector.broadcast %171 : f32 to vector<8x128xf32>
    %173 = arith.addf %170, %172 : vector<8x128xf32>
    %cst_83 = arith.constant 0.000000e+00 : f32
    %174 = vector.broadcast %cst_83 : f32 to vector<8x128xf32>
    %175 = arith.maximumf %173, %174 : vector<8x128xf32>
    %c0_84 = arith.constant 0 : index
    %176 = memref.load %arg5[%c0_84] : memref<4xf32, #tpu.memory_space<smem>>
    %177 = vector.broadcast %176 : f32 to vector<8x128xf32>
    %178 = arith.mulf %115, %177 : vector<8x128xf32>
    %c1_85 = arith.constant 1 : index
    %179 = memref.load %arg5[%c1_85] : memref<4xf32, #tpu.memory_space<smem>>
    %180 = vector.broadcast %179 : f32 to vector<8x128xf32>
    %181 = arith.mulf %135, %180 : vector<8x128xf32>
    %182 = arith.addf %178, %181 : vector<8x128xf32>
    %c2_86 = arith.constant 2 : index
    %183 = memref.load %arg5[%c2_86] : memref<4xf32, #tpu.memory_space<smem>>
    %184 = vector.broadcast %183 : f32 to vector<8x128xf32>
    %185 = arith.mulf %155, %184 : vector<8x128xf32>
    %186 = arith.addf %182, %185 : vector<8x128xf32>
    %c3_87 = arith.constant 3 : index
    %187 = memref.load %arg5[%c3_87] : memref<4xf32, #tpu.memory_space<smem>>
    %188 = vector.broadcast %187 : f32 to vector<8x128xf32>
    %189 = arith.mulf %175, %188 : vector<8x128xf32>
    %190 = arith.addf %186, %189 : vector<8x128xf32>
    %c0_88 = arith.constant 0 : index
    %191 = memref.load %arg6[%c0_88] : memref<1xf32, #tpu.memory_space<smem>>
    %192 = vector.broadcast %191 : f32 to vector<8x128xf32>
    %193 = arith.addf %190, %192 : vector<8x128xf32>
    %cst_89 = arith.constant 5.000000e-01 : f32
    %194 = vector.broadcast %cst_89 : f32 to vector<8x128xf32>
    %195 = arith.mulf %194, %193 : vector<8x128xf32>
    %196 = math.tanh %195 : vector<8x128xf32>
    %cst_90 = arith.constant 5.000000e-01 : f32
    %197 = vector.broadcast %cst_90 : f32 to vector<8x128xf32>
    %198 = arith.mulf %197, %196 : vector<8x128xf32>
    %cst_91 = arith.constant 5.000000e-01 : f32
    %199 = vector.broadcast %cst_91 : f32 to vector<8x128xf32>
    %200 = arith.addf %198, %199 : vector<8x128xf32>
    %201 = arith.index_cast %3 : i32 to index
    %c0_92 = arith.constant 0 : index
    %202 = vector.load %arg8[%201, %c0_92] : memref<8x128xf32, #tpu.memory_space<vmem>>, vector<8x128xf32>
    tpu.vector_store %arg8[%201, %c0_92], %200 {strides = array<i32>} : memref<8x128xf32, #tpu.memory_space<vmem>>, vector<8x128xf32>,
    %c1_i32_93 = arith.constant 1 : i32
    return
  }
  func.func @transform_0(%arg0: i32) -> (i32, i32) {
    %c0_i32 = arith.constant 0 : i32
    %c0_i32_0 = arith.constant 0 : i32
    %c0_i32_1 = arith.constant 0 : i32
    return %c0_i32, %c0_i32_0 : i32, i32
  }
  func.func @transform_1(%arg0: i32) -> i32 {
    %c0_i32 = arith.constant 0 : i32
    %c0_i32_0 = arith.constant 0 : i32
    return %c0_i32 : i32
  }
  func.func @transform_2(%arg0: i32) -> (i32, i32) {
    %c0_i32 = arith.constant 0 : i32
    %c0_i32_0 = arith.constant 0 : i32
    %c0_i32_1 = arith.constant 0 : i32
    return %c0_i32, %c0_i32_0 : i32, i32
  }
  func.func @transform_3(%arg0: i32) -> i32 {
    %c0_i32 = arith.constant 0 : i32
    %c0_i32_0 = arith.constant 0 : i32
    return %c0_i32 : i32
  }
  func.func @transform_4(%arg0: i32) -> i32 {
    %c0_i32 = arith.constant 0 : i32
    %c0_i32_0 = arith.constant 0 : i32
    return %c0_i32 : i32
  }
  func.func @transform_5(%arg0: i32) -> i32 {
    %c0_i32 = arith.constant 0 : i32
    %c0_i32_0 = arith.constant 0 : i32
    return %c0_i32 : i32
  }
  func.func @transform_6(%arg0: i32) -> (i32, i32, i32) {
    %c0_i32 = arith.constant 0 : i32
    %c0_i32_0 = arith.constant 0 : i32
    %c0_i32_1 = arith.constant 0 : i32
    return %c0_i32, %arg0, %c0_i32_0 : i32, i32, i32
  }
  func.func @transform_7(%arg0: i32) -> (i32, i32) {
    %c0_i32 = arith.constant 0 : i32
    %c0_i32_0 = arith.constant 0 : i32
    return %arg0, %c0_i32 : i32, i32
  }
}

</mosaic_0001>

<bundles_post_ra>
// kernel: tpu_custom_call.1
= control target key start
LH: loop header
LB: loop body
LE: loop exit
PB: predicated region body
PF: predicated region fallthrough
CT: control target
= control target key end

     0   :  { %13 = vsyncpa [#allocation6], 0  ;;  %s589_s0 = inlined_call_operand.hbm [shape: f32[4,4], index: 0, kind: input, shape index: {}]   ;;  %s590_s1 = inlined_call_operand.vmem [shape: f32[4], index: 1, kind: input, shape index: {}]   ;;  %s591_s2 = inlined_call_operand.vmem [shape: f32[4,4], index: 2, kind: input, shape index: {}]   ;;  %s592_s3 = inlined_call_operand.vmem [shape: f32[4], index: 3, kind: input, shape index: {}]   ;;  %s593_s4 = inlined_call_operand.vmem [shape: f32[4], index: 4, kind: input, shape index: {}]   ;;  %s594_s5 = inlined_call_operand.<no memory space> [shape: f32[1], index: 5, kind: input, shape index: {}]   ;;  %s595_s6 = inlined_call_operand.hbm [shape: f32[4,8,128], index: 6, kind: input, shape index: {}]   ;;  %s596_s7 = inlined_call_operand.hbm [shape: f32[8,128], index: 7, kind: output, shape index: {}]  }
   0x1   :  { %14 = vsyncpa [#allocation7], 0 }
   0x2   :  { %15 = vsyncpa [#allocation10], 0 }
   0x3   :  { %16 = vsyncpa [#allocation13], 0 }
   0x4   :  { %17 = vsyncpa [#allocation4], 0  ;;  %s43_s26 = sshll.u32 %s591_s2, 4  ;;  %s44_s26 = int_to_ptr.vmem [resolvable:$true] %s43_s26 }
   0x5   :  { %18 = vsyncpa [#allocation5], 0  ;;  %s357_s27 = scalar_lea.vmem %s44_s26, 64  ;;  %p362_p1 = scmp.lt.s32.totalorder %s44_s26, %s44_s26 }
   0x6   :  { %p358_p0 = scmp.ne.s32.totalorder %s44_s26, %s357_s27  ;;  %p363_p2 = scmp.lt.s32.totalorder %s357_s27, %s357_s27 }
   0x8   :  { %p364_p3 = por %p363_p2, %p362_p1 }
   0xa   :  { %p365_p4 = pnand %p364_p3, %p358_p0 }
   0xc   :  { %368 = shalt.err (!%p365_p4)
}
   0xd   :  { %s465_s28 = smov [#allocation9]   ;;  %s466_s29 = smov [#allocation3]  }
   0xe   :  { %46 = dma.vmem_to_smem %s44_s26, 64, %s465_s28, [#allocation10]  }
   0xf   :  { %26 = dma.hbm_to_smem %s589_s0, 64, %s466_s29, [#allocation6]  }
  0x10   :  { %s33_s2 = sshll.u32 %s590_s1, 4  ;;  %s53_s13 = sshll.u32 %s592_s3, 4  ;;  %s34_s2 = int_to_ptr.vmem [resolvable:$true] %s33_s2  ;;  %s54_s13 = int_to_ptr.vmem [resolvable:$true] %s53_s13 }
  0x11   :  { %s377_s14 = scalar_lea.vmem %s34_s2, 16  ;;  %p382_p6 = scmp.lt.s32.totalorder %s34_s2, %s34_s2 }
  0x12   :  { %p378_p5 = scmp.ne.s32.totalorder %s34_s2, %s377_s14  ;;  %p383_p7 = scmp.lt.s32.totalorder %s377_s14, %s377_s14 }
  0x14   :  { %p384_p8 = por %p383_p7, %p382_p6 }
  0x16   :  { %p385_p9 = pnand %p384_p8, %p378_p5 }
  0x18   :  { %388 = shalt.err (!%p385_p9)
}
  0x19   :  { %s467_s15 = smov [#allocation8]   ;;  %s389_s0 = scalar_lea.vmem %s54_s13, 16 }
  0x1a   :  { %36 = dma.vmem_to_smem %s34_s2, 16, %s467_s15, [#allocation7]  }
  0x1b   :  { %p390_p10 = scmp.ne.s32.totalorder %s54_s13, %s389_s0  ;;  %p394_p11 = scmp.lt.s32.totalorder %s54_s13, %s54_s13 }
  0x1c   :  { %p395_p12 = scmp.lt.s32.totalorder %s389_s0, %s389_s0 }
  0x1e   :  { %p396_p13 = por %p395_p12, %p394_p11 }
  0x20   :  { %p397_p0 = pnand %p396_p13, %p390_p10 }
  0x22   :  { %400 = shalt.err (!%p397_p0)
}
  0x23   :  { %s468_s1 = smov [#allocation11]   ;;  %s63_s17 = sshll.u32 %s593_s4, 4  ;;  %s64_s17 = int_to_ptr.vmem [resolvable:$true] %s63_s17 }
  0x24   :  { %56 = dma.vmem_to_smem %s54_s13, 16, %s468_s1, [#allocation10]  }
  0x25   :  { %s401_s18 = scalar_lea.vmem %s64_s17, 16  ;;  %p406_p2 = scmp.lt.s32.totalorder %s64_s17, %s64_s17 }
  0x26   :  { %p402_p1 = scmp.ne.s32.totalorder %s64_s17, %s401_s18  ;;  %p407_p3 = scmp.lt.s32.totalorder %s401_s18, %s401_s18 }
  0x28   :  { %p408_p4 = por %p407_p3, %p406_p2 }
  0x2a   :  { %p409_p5 = pnand %p408_p4, %p402_p1 }
  0x2c   :  { %412 = shalt.err (!%p409_p5)
}
  0x2d   :  { %s469_s19 = smov [#allocation12]   ;;  %s470_s20 = smov [#allocation14]  }
  0x2e   :  { %66 = dma.vmem_to_smem %s64_s17, 16, %s469_s19, [#allocation13]  }
  0x2f   :  { %s74_s21 = sshll.u32 %s470_s20, 4  ;;  %s75_s21 = int_to_ptr.vmem [resolvable:$true] %s74_s21 }
  0x30   :  { %s421_s22 = scalar_lea.vmem %s75_s21, 512  ;;  %p426_p7 = scmp.lt.s32.totalorder %s75_s21, %s75_s21 }
  0x31   :  { %p422_p6 = scmp.ne.s32.totalorder %s75_s21, %s421_s22  ;;  %p427_p8 = scmp.lt.s32.totalorder %s421_s22, %s421_s22 }
  0x33   :  { %p428_p9 = por %p427_p8, %p426_p7 }
  0x35   :  { %p429_p10 = pnand %p428_p9, %p422_p6 }
  0x37   :  { %432 = shalt.err (!%p429_p10)
}
  0x38   :  { %s471_s4 = smov 128   ;;  %s472_s23 = smov 8  }
  0x39   :  { %80 = dma.hbm_to_vmem [thread:$0]  %s595_s6, 512, %s75_s21, [#allocation4], %s471_s4, %s471_s4, %s472_s23  }
  0x3a   :  { %453 = dma.done.wait [#allocation6], 64  }
  0x3b   :  { %454 = vsyncadd [#allocation6], 4294967232 }
  0x3c   :  { %455 = dma.done.wait [#allocation7], 16  }
  0x3d   :  { %456 = vsyncadd [#allocation7], 4294967280 }
  0x3e   :  { %457 = dma.done.wait [#allocation10], 80  }
  0x3f   :  { %458 = vsyncadd [#allocation10], 4294967216 }
  0x40   :  { %459 = dma.done.wait [#allocation13], 16  }
  0x41   :  { %460 = vsyncadd [#allocation13], 4294967280 }
  0x42   :  { %461 = dma.done.wait [#allocation4], 512  }
  0x43   :  { %462 = vsyncadd [#allocation4], 4294966784 }
  0x44   :  { %99 = sfence }
  0x45   :  { %s110_s26 = sld [smem:[#allocation3]]  ;;  %v100_v0 = vld [vmem:[#allocation14] sm:$0xff]  ;;  %v103_v1 = vld [vmem:[#allocation14 + $0x8] sm:$0xff]  ;;  %v534_v2 = vld [vmem:[#allocation14 + $0x10] sm:$0xff] }
  0x46   :  { %s307_s27 = sld [smem:[#allocation3 + $0x80]]  ;;  %v536_v6 = vld [vmem:[#allocation14 + $0x18] sm:$0xff] }
  0x47   :  { %s308_s28 = sld [smem:[#allocation3 + $0x100]] }
  0x48   :  { %s309_s29 = sld [smem:[#allocation3 + $0x180]] }
  0x49   :  { %s532_s30 = sld [smem:[#allocation8]] }
  0x4a   :  { %s310_s6 = sld [smem:[#allocation3 + $0x1]] }
  0x4b   :  { %v111_v3 = vstv %s110_s26  ;;  %s311_s8 = sld [smem:[#allocation3 + $0x81]] }
  0x4c   :  { %v112_v4 = vmul.f32 %v111_v3, %v100_v0  ;;  %v114_v5 = vstv %s307_s27  ;;  %s312_s9 = sld [smem:[#allocation3 + $0x101]] }
  0x4d   :  { %v115_v7 = vmul.f32 %v114_v5, %v103_v1  ;;  %v118_v8 = vstv %s308_s28  ;;  %s313_s10 = sld [smem:[#allocation3 + $0x181]] }
  0x4e   :  { %v119_v9 = vmul.f32 %v118_v8, %v534_v2  ;;  %v122_v10 = vstv %s309_s29  ;;  %s539_s2 = sld [smem:[#allocation8 + $0x1]] }
  0x4f   :  { %v116_v11 = vadd.f32 %v115_v7, %v112_v4  ;;  %s315_s11 = sld [smem:[#allocation3 + $0x2]]  ;;  %v123_v12 = vmul.f32 %v122_v10, %v536_v6  ;;  %v126_v24 = vstv %s532_s30 }
  0x50   :  { %v130_v13 = vstv %s310_s6  ;;  %s316_s12 = sld [smem:[#allocation3 + $0x82]] }
  0x51   :  { %v120_v14 = vadd.f32 %v119_v9, %v116_v11  ;;  %v131_v15 = vmul.f32 %v130_v13, %v100_v0  ;;  %v133_v16 = vstv %s311_s8  ;;  %s317_s13 = sld [smem:[#allocation3 + $0x102]] }
  0x52   :  { %v134_v17 = vmul.f32 %v133_v16, %v103_v1  ;;  %v137_v18 = vstv %s312_s9  ;;  %s318_s14 = sld [smem:[#allocation3 + $0x182]] }
  0x53   :  { %v138_v19 = vmul.f32 %v137_v18, %v534_v2  ;;  %v141_v20 = vstv %s313_s10  ;;  %s543_s15 = sld [smem:[#allocation8 + $0x2]]  ;;  %v124_v21 = vadd.f32 %v123_v12, %v120_v14 }
  0x54   :  { %v135_v22 = vadd.f32 %v134_v17, %v131_v15  ;;  %v142_v23 = vmul.f32 %v141_v20, %v536_v6  ;;  %s320_s0 = sld [smem:[#allocation3 + $0x3]]  ;;  %v145_v29 = vstv %s539_s2 }
  0x55   :  { %v149_v25 = vstv %s315_s11  ;;  %s321_s1 = sld [smem:[#allocation3 + $0x83]]  ;;  %v127_v32 = vadd.f32 %v126_v24, %v124_v21 }
  0x56   :  { %v139_v26 = vadd.f32 %v138_v19, %v135_v22  ;;  %v150_v27 = vmul.f32 %v149_v25, %v100_v0  ;;  %v152_v28 = vstv %s316_s12  ;;  %s322_s3 = sld [smem:[#allocation3 + $0x103]] }
  0x57   :  { %v153_v30 = vmul.f32 %v152_v28, %v103_v1  ;;  %v156_v31 = vstv %s317_s13  ;;  %s323_s16 = sld [smem:[#allocation3 + $0x183]]  ;;  %v552_v43 = vmax.f32 %v127_v32, 0.0 }
  0x58   :  { %v143_v33 = vadd.f32 %v142_v23, %v139_v26  ;;  %v157_v34 = vmul.f32 %v156_v31, %v534_v2  ;;  %v160_v35 = vstv %s318_s14  ;;  %s549_s17 = sld [smem:[#allocation8 + $0x3]] }
  0x59   :  { %v154_v36 = vadd.f32 %v153_v30, %v150_v27  ;;  %v161_v37 = vmul.f32 %v160_v35, %v536_v6  ;;  %s186_s18 = sld [smem:[#allocation9]]  ;;  %v164_v44 = vstv %s543_s15 }
  0x5a   :  { %v146_v38 = vadd.f32 %v145_v29, %v143_v33  ;;  %v168_v39 = vstv %s320_s0  ;;  %s325_s19 = sld [smem:[#allocation9 + $0x80]] }
  0x5b   :  { %v158_v40 = vadd.f32 %v157_v34, %v154_v36  ;;  %v169_v41 = vmul.f32 %v168_v39, %v100_v0  ;;  %v171_v42 = vstv %s321_s1  ;;  %s326_s20 = sld [smem:[#allocation9 + $0x100]] }
  0x5c   :  { %v172_v45 = vmul.f32 %v171_v42, %v103_v1  ;;  %v175_v46 = vstv %s322_s3  ;;  %s555_s21 = sld [smem:[#allocation9 + $0x180]]  ;;  %v557_v47 = vmax.f32 %v146_v38, 0.0  ;;  %s473_s3 = smov [#allocation15]  }
  0x5d   :  { %v162_v48 = vadd.f32 %v161_v37, %v158_v40  ;;  %v176_v49 = vmul.f32 %v175_v46, %v534_v2  ;;  %v179_v50 = vstv %s323_s16  ;;  %s560_s22 = sld [smem:[#allocation11]]  ;;  %s291_s16 = sshll.u32 %s473_s3, 4  ;;  %s292_s16 = int_to_ptr.vmem [resolvable:$true] %s291_s16 }
  0x5e   :  { %v173_v51 = vadd.f32 %v172_v45, %v169_v41  ;;  %v180_v52 = vmul.f32 %v179_v50, %v536_v6  ;;  %s328_s4 = sld [smem:[#allocation9 + $0x1]]  ;;  %v183_v59 = vstv %s549_s17  ;;  %s433_s17 = scalar_lea.vmem %s292_s16, 128 }
  0x5f   :  { %v165_v53 = vadd.f32 %v164_v44, %v162_v48  ;;  %v187_v54 = vstv %s186_s18  ;;  %s329_s23 = sld [smem:[#allocation9 + $0x81]]  ;;  %p434_p11 = scmp.ne.s32.totalorder %s292_s16, %s433_s17 }
  0x60   :  { %v177_v55 = vadd.f32 %v176_v49, %v173_v51  ;;  %v188_v56 = vmul.f32 %v187_v54, %v552_v43  ;;  %v190_v57 = vstv %s325_s19  ;;  %s330_s24 = sld [smem:[#allocation9 + $0x101]]  ;;  %p438_p12 = scmp.lt.s32.totalorder %s292_s16, %s292_s16 }
  0x61   :  { %v166_v58 = vmax.f32 %v165_v53, 0.0  ;;  %v191_v60 = vmul.f32 %v190_v57, %v557_v47  ;;  %v194_v61 = vstv %s326_s20  ;;  %s331_s25 = sld [smem:[#allocation9 + $0x181]]  ;;  %p439_p13 = scmp.lt.s32.totalorder %s433_s17, %s433_s17 }
  0x62   :  { %v181_v62 = vadd.f32 %v180_v52, %v177_v55  ;;  %s566_s26 = sld [smem:[#allocation11 + $0x1]]  ;;  %v198_v3 = vstv %s555_s21 }
  0x63   :  { %v192_v63 = vadd.f32 %v191_v60, %v188_v56  ;;  %v195_v0 = vmul.f32 %v194_v61, %v166_v58  ;;  %s333_s27 = sld [smem:[#allocation9 + $0x2]]  ;;  %v202_v15 = vstv %s560_s22  ;;  %p440_p0 = por %p439_p13, %p438_p12 }
  0x64   :  { %v184_v1 = vadd.f32 %v183_v59, %v181_v62  ;;  %v206_v2 = vstv %s328_s4  ;;  %s334_s28 = sld [smem:[#allocation9 + $0x82]]  ;;  %v278_v62 = vstv %s594_s5 }
  0x65   :  { %v207_v4 = vmul.f32 %v206_v2, %v552_v43  ;;  %v209_v5 = vstv %s329_s23  ;;  %s335_s29 = sld [smem:[#allocation9 + $0x102]]  ;;  %v196_v7 = vadd.f32 %v195_v0, %v192_v63  ;;  %p441_p1 = pnand %p440_p0, %p434_p11 }
  0x66   :  { %v185_v6 = vmax.f32 %v184_v1, 0.0  ;;  %v210_v8 = vmul.f32 %v209_v5, %v557_v47  ;;  %v213_v9 = vstv %s330_s24  ;;  %s336_s30 = sld [smem:[#allocation9 + $0x182]] }
  0x67   :  { %v214_v10 = vmul.f32 %v213_v9, %v166_v58  ;;  %v217_v11 = vstv %s331_s25  ;;  %s571_s6 = sld [smem:[#allocation11 + $0x2]] }
  0x68   :  { %v199_v12 = vmul.f32 %v198_v3, %v185_v6  ;;  %v211_v13 = vadd.f32 %v210_v8, %v207_v4  ;;  %v218_v14 = vmul.f32 %v217_v11, %v185_v6  ;;  %s338_s8 = sld [smem:[#allocation9 + $0x3]]  ;;  %v221_v21 = vstv %s566_s26 }
  0x69   :  { %v225_v16 = vstv %s333_s27  ;;  %s339_s9 = sld [smem:[#allocation9 + $0x83]] }
  0x6a   :  { %v200_v17 = vadd.f32 %v199_v12, %v196_v7  ;;  %v215_v18 = vadd.f32 %v214_v10, %v211_v13  ;;  %v226_v19 = vmul.f32 %v225_v16, %v552_v43  ;;  %v228_v20 = vstv %s334_s28  ;;  %s340_s10 = sld [smem:[#allocation9 + $0x103]] }
  0x6b   :  { %v229_v22 = vmul.f32 %v228_v20, %v557_v47  ;;  %v232_v23 = vstv %s335_s29  ;;  %s341_s2 = sld [smem:[#allocation9 + $0x183]] }
  0x6c   :  { %v203_v24 = vadd.f32 %v202_v15, %v200_v17  ;;  %v219_v25 = vadd.f32 %v218_v14, %v215_v18  ;;  %v233_v26 = vmul.f32 %v232_v23, %v166_v58  ;;  %v236_v27 = vstv %s336_s30  ;;  %s577_s11 = sld [smem:[#allocation11 + $0x3]] }
  0x6d   :  { %v230_v28 = vadd.f32 %v229_v22, %v226_v19  ;;  %v237_v29 = vmul.f32 %v236_v27, %v185_v6  ;;  %s262_s12 = sld [smem:[#allocation12]]  ;;  %v240_v36 = vstv %s571_s6 }
  0x6e   :  { %v222_v30 = vadd.f32 %v221_v21, %v219_v25  ;;  %v244_v31 = vstv %s338_s8  ;;  %s343_s13 = sld [smem:[#allocation12 + $0x1]]  ;;  %v204_v35 = vmax.f32 %v203_v24, 0.0 }
  0x6f   :  { %v234_v32 = vadd.f32 %v233_v26, %v230_v28  ;;  %v245_v33 = vmul.f32 %v244_v31, %v552_v43  ;;  %v247_v34 = vstv %s339_s9  ;;  %s344_s14 = sld [smem:[#allocation12 + $0x2]] }
  0x70   :  { %v248_v37 = vmul.f32 %v247_v34, %v557_v47  ;;  %v251_v38 = vstv %s340_s10  ;;  %v223_v39 = vmax.f32 %v222_v30, 0.0  ;;  %s345_s15 = sld [smem:[#allocation12 + $0x3]] }
  0x71   :  { %v238_v40 = vadd.f32 %v237_v29, %v234_v32  ;;  %v252_v41 = vmul.f32 %v251_v38, %v166_v58  ;;  %v255_v42 = vstv %s341_s2 }
  0x72   :  { %v249_v44 = vadd.f32 %v248_v37, %v245_v33  ;;  %v256_v45 = vmul.f32 %v255_v42, %v185_v6  ;;  %v259_v52 = vstv %s577_s11 }
  0x73   :  { %v241_v46 = vadd.f32 %v240_v36, %v238_v40  ;;  %v263_v48 = vstv %s262_s12 }
  0x74   :  { %v253_v49 = vadd.f32 %v252_v41, %v249_v44  ;;  %v264_v50 = vmul.f32 %v263_v48, %v204_v35  ;;  %v266_v43 = vstv %s343_s13 }
  0x75   :  { %v242_v51 = vmax.f32 %v241_v46, 0.0  ;;  %v267_v53 = vmul.f32 %v266_v43, %v223_v39  ;;  %v270_v54 = vstv %s344_s14 }
  0x76   :  { %v257_v55 = vadd.f32 %v256_v45, %v253_v49  ;;  %v274_v59 = vstv %s345_s15 }
  0x77   :  { %v268_v56 = vadd.f32 %v267_v53, %v264_v50  ;;  %v271_v47 = vmul.f32 %v270_v54, %v242_v51 }
  0x78   :  { %v260_v57 = vadd.f32 %v259_v52, %v257_v55 }
  0x79   :  { %v272_v58 = vadd.f32 %v271_v47, %v268_v56 }
  0x7a   :  { %v261_v60 = vmax.f32 %v260_v57, 0.0 }
  0x7c   :  { %v275_v61 = vmul.f32 %v274_v59, %v261_v60 }
  0x7e   :  { %v276_v63 = vadd.f32 %v275_v61, %v272_v58 }
  0x80   :  { %v279_v0 = vadd.f32 %v278_v62, %v276_v63 }
  0x82   :  { %v280_v1 = vmul.f32 0.5, %v279_v0 }
  0x84   :  { %355 = vtanh.f32 %v280_v1 }
  0x91   :  { %v356_v2 = vpop.eup %355 }
  0x92   :  { %v282_v3 = vmul.f32 0.5, %v356_v2 }
  0x94   :  { %v283_v4 = vadd.f32 0.5, %v282_v3 }
  0x96   :  { %284 = vst [vmem:[#allocation15] sm:$0xff] %v283_v4 }
  0x97   :  { %444 = shalt.err (!%p441_p1)
}
  0x98   :  { %294 = dma.vmem_to_hbm [thread:$0]  %s292_s16, 128, %s596_s7, [#allocation5]  }
  0x99   :  { %463 = dma.done.wait [#allocation5], 128  }
  0x9a   :  { %464 = vsyncadd [#allocation5], 4294967168 }
  0x9b   :  { %298 = vsyncpa [#allocation4], 1 }
  0x9c   :  { %299 = vsyncpa [#allocation5], 1 }
  0x9d   :  { %300 = vsyncpa [#allocation6], 1 }
  0x9e   :  { %301 = vsyncpa [#allocation7], 1 }
  0x9f   :  { %302 = vsyncpa [#allocation10], 1 }
  0xa0   :  { %303 = vsyncpa [#allocation13], 1 }

</bundles_post_ra>
